<compile_context>
chip_gen: v7x
topology: tpu7x:2x2x1
jax: 0.10.0
libtpu: 0.0.40
codegen_flags: <defaults>
</compile_context>

<pallas_src>
import functools

import numpy as np
import jax
import jax.numpy as jnp
from jax import lax
from jax.experimental import pallas as pl
from jax.experimental.pallas import tpu as pltpu


_FLAT_P_BUDGET_BYTES = 4 * 1024 * 1024   # max size of the resident (HW, HW) permutation matrix
_TILE_BUDGET_BYTES = 2 * 1024 * 1024     # soft cap on one input tile
_VMEM_LIMIT_BYTES = 32 * 1024 * 1024


# ---------------------------------------------------------------------------
# Flat path: rotation as a lane-dense (rows, HW) @ (HW, HW) permutation matmul.
# One pallas_call handles every rotation index (k is data, not code).
# ---------------------------------------------------------------------------
def _flat_rot_kernel(mask_ref, p_ref, x_ref, o_ref):
    # mask_ref: VMEM (Rt, 1) f32   per-row blend mask (1 -> keep input, 0 -> rotated)
    # p_ref:    VMEM (HW, HW)      permutation matrix, resident (constant index_map)
    # x_ref/o_ref: VMEM (Rt, HW)   row tile of flattened (batch, channel) planes
    x = x_ref[...]
    p = p_ref[...]
    rot = jnp.dot(x.astype(p.dtype), p, preferred_element_type=jnp.float32)
    m = mask_ref[...]                                   # (Rt, 1) float32
    out = m * x.astype(jnp.float32) + (1.0 - m) * rot
    o_ref[...] = out.astype(o_ref.dtype)


def _row_tile(rows, cap_rows, sublane_mult):
    """Largest divisor of `rows` that is <= cap and sublane-aligned (or the full dim)."""
    if rows <= cap_rows:
        return rows
    cap = max(1, min(rows, cap_rows))
    for d in range(cap, 0, -1):
        if rows % d == 0 and d % sublane_mult == 0:
            return d
    return rows


def _rotation_flat(x, aug_k, mask_f32, op_dtype):
    N, C, H, W = x.shape
    HW = H * W
    rows = N * C

    # Static table: source flat-index of each output position, for every k.
    base = np.arange(HW, dtype=np.int32).reshape(H, W)
    all_src = np.stack([np.rot90(base, k).reshape(-1) for k in range(4)])   # (4, HW)

    k = (aug_k[0] % 4).astype(jnp.int32)
    src = jnp.take(jnp.asarray(all_src), k, axis=0)                         # (HW,)
    # P[q, p] = 1 iff q == src[p]  =>  (x_flat @ P)[r, p] = x_flat[r, src[p]]
    p_mat = (jnp.arange(HW, dtype=jnp.int32)[:, None] == src[None, :]).astype(op_dtype)

    x2 = x.reshape(rows, HW)                        # free reshape of contiguous NCHW
    mask_rows = jnp.repeat(mask_f32, C).reshape(rows, 1)

    itemsize = jnp.dtype(x.dtype).itemsize
    sublane_mult = 8 * (4 // itemsize) if itemsize < 4 else 8
    cap_rows = max(1, _TILE_BUDGET_BYTES // (HW * itemsize))
    rt = _row_tile(rows, cap_rows, sublane_mult)

    out2 = pl.pallas_call(
        _flat_rot_kernel,
        out_shape=jax.ShapeDtypeStruct((rows, HW), x.dtype),
        grid=(rows // rt,),
        in_specs=[
            pl.BlockSpec((rt, 1), lambda i: (i, 0)),
            pl.BlockSpec((HW, HW), lambda i: (0, 0)),   # resident permutation matrix
            pl.BlockSpec((rt, HW), lambda i: (i, 0)),
        ],
        out_specs=pl.BlockSpec((rt, HW), lambda i: (i, 0)),
        compiler_params=pltpu.CompilerParams(
            dimension_semantics=("parallel",),
            vmem_limit_bytes=_VMEM_LIMIT_BYTES),
    )(mask_rows, p_mat, x2)
    return out2.reshape(N, C, H, W)


# ---------------------------------------------------------------------------
# Fallback path (large planes): per-plane exchange-matrix (J) matmuls.
# ---------------------------------------------------------------------------
def _make_plane_rot_kernel(k):
    """Kernel specialized for a fixed rotation count k in {1, 2, 3}."""

    def kernel(mask_ref, j_ref, x_ref, o_ref):
        # mask_ref: SMEM float32[N]        per-sample blend mask
        # j_ref:    VMEM (H, H)            exchange matrix J, resident across steps
        # x_ref/o_ref: VMEM (1, Ct, H, W)  (batch, channel-tile) tile
        b = pl.program_id(0)
        x = x_ref[0]                                     # (Ct, H, W)
        ct = x.shape[0]
        j = j_ref[...]
        xd = x.astype(j.dtype)
        jb = jnp.broadcast_to(j, (ct,) + j.shape)

        if k == 1:      # out[c,i,j] = x[c, j, W-1-i]  ==  J @ x[c]^T
            rot = jnp.einsum('cim,cjm->cij', jb, xd,
                             preferred_element_type=jnp.float32)
        elif k == 2:    # out[c,i,j] = x[c, H-1-i, W-1-j]  ==  J @ x[c] @ J
            t = jnp.einsum('cmn,cnj->cmj', xd, jb,
                           preferred_element_type=jnp.float32)
            rot = jnp.einsum('cim,cmj->cij', jb, t.astype(j.dtype),
                             preferred_element_type=jnp.float32)
        else:           # out[c,i,j] = x[c, H-1-j, i]  ==  x[c]^T @ J
            rot = jnp.einsum('cmi,cmj->cij', xd, jb,
                             preferred_element_type=jnp.float32)

        m = mask_ref[b]
        out = m * x.astype(jnp.float32) + (1.0 - m) * rot
        o_ref[0] = out.astype(o_ref.dtype)

    return kernel


def _largest_divisor_at_most(n, cap):
    cap = max(1, min(n, cap))
    for d in range(cap, 0, -1):
        if n % d == 0:
            return d
    return 1


def _plane_rot_branch(k, x, mask_f32, j_mat, ct):
    N, C, H, W = x.shape
    grid_spec = pltpu.PrefetchScalarGridSpec(
        num_scalar_prefetch=1,
        grid=(N, C // ct),
        in_specs=[
            pl.BlockSpec((H, H), lambda b, c, msk: (0, 0)),     # resident J
            pl.BlockSpec((1, ct, H, W), lambda b, c, msk: (b, c, 0, 0)),
        ],
        out_specs=pl.BlockSpec((1, ct, H, W), lambda b, c, msk: (b, c, 0, 0)),
    )
    return pl.pallas_call(
        _make_plane_rot_kernel(k),
        out_shape=jax.ShapeDtypeStruct(x.shape, x.dtype),
        grid_spec=grid_spec,
        compiler_params=pltpu.CompilerParams(
            dimension_semantics=("parallel", "parallel"),
            vmem_limit_bytes=_VMEM_LIMIT_BYTES),
    )(mask_f32, j_mat, x)


def _rotation_plane(x, aug_k, mask_f32, op_dtype):
    N, C, H, W = x.shape
    j_mat = jnp.flipud(jnp.eye(H, dtype=op_dtype))     # exchange / anti-identity matrix

    itemsize = jnp.dtype(x.dtype).itemsize
    cap = max(1, _TILE_BUDGET_BYTES // (H * W * itemsize))
    ct = _largest_divisor_at_most(C, cap)

    branches = [
        lambda: x,     # k == 0: mask*x + (1-mask)*x == x, no kernel needed
        functools.partial(_plane_rot_branch, 1, x, mask_f32, j_mat, ct),
        functools.partial(_plane_rot_branch, 2, x, mask_f32, j_mat, ct),
        functools.partial(_plane_rot_branch, 3, x, mask_f32, j_mat, ct),
    ]
    return lax.switch(aug_k[0] % 4, branches)


# ---------------------------------------------------------------------------
# Public API
# ---------------------------------------------------------------------------
def rotation_pallas(x, aug_k, mask):
    """x: (N, C, H, W) with H == W; aug_k: int32[1] rotation count; mask: float[N]."""
    N, C, H, W = x.shape
    assert H == W, "square spatial dims required (same constraint as torch blend path)"

    mask_f32 = mask.astype(jnp.float32)
    op_dtype = jnp.bfloat16 if x.dtype == jnp.bfloat16 else jnp.float32
    p_bytes = (H * W) * (H * W) * jnp.dtype(op_dtype).itemsize
    if p_bytes <= _FLAT_P_BUDGET_BYTES:
        return _rotation_flat(x, aug_k, mask_f32, op_dtype)
    return _rotation_plane(x, aug_k, mask_f32, op_dtype)


def rotation_forward(x, aug_index=None, *, key=None, prob=0.5, max_range=4):
    """JAX equivalent of Rotation.forward (randomness supplied via `key`)."""
    N = x.shape[0]
    if aug_index is None:
        kk, km = jax.random.split(key)
        aug_k = jax.random.randint(kk, (1,), 0, 4, dtype=jnp.int32)
        mask = jax.random.bernoulli(km, prob, (N,)).astype(jnp.float32)
    else:
        aug_k = jnp.array([aug_index % max_range], dtype=jnp.int32)
        mask = jnp.zeros((N,), dtype=jnp.float32)
    return rotation_pallas(x, aug_k, mask), aug_k, mask


if __name__ == "__main__":
    key = jax.random.PRNGKey(0)
    kx, kk, km, kx2 = jax.random.split(key, 4)

    # --- Flat (lane-dense permutation-matmul) path: small plane --------------
    N, C, H, W = 2, 4, 16, 16
    x = jax.random.normal(kx, (N, C, H, W), dtype=jnp.float32)

    mask_det = jnp.zeros((N,), dtype=jnp.float32)
    for aug_index in range(4):
        k_det = jnp.array([aug_index % 4], dtype=jnp.int32)
        out_det = jax.block_until_ready(rotation_pallas(x, k_det, mask_det))
        ref_det = jnp.rot90(x, aug_index % 4, axes=(2, 3))
        assert out_det.shape == ref_det.shape and out_det.dtype == ref_det.dtype
        assert jnp.allclose(out_det, ref_det, atol=1e-5), (
            f"flat path mismatch (k={aug_index})")

    k_rand = jax.random.randint(kk, (1,), 0, 4, dtype=jnp.int32)
    mask_rand = jax.random.bernoulli(km, 0.5, (N,)).astype(jnp.float32)
    out_rand = jax.block_until_ready(rotation_pallas(x, k_rand, mask_rand))
    rot_ref = jnp.rot90(x, int(k_rand[0]), axes=(2, 3))
    m = mask_rand.reshape(-1, 1, 1, 1)
    ref_rand = m * x + (1.0 - m) * rot_ref
    assert jnp.allclose(out_rand, ref_rand, atol=1e-5), "flat path random blend mismatch"

    # --- Fallback (per-plane exchange-matrix) path: larger plane --------------
    Nb, Cb, Hb, Wb = 2, 4, 64, 64
    xb = jax.random.normal(kx2, (Nb, Cb, Hb, Wb), dtype=jnp.float32)
    mask_b = jnp.zeros((Nb,), dtype=jnp.float32)
    for aug_index in range(4):
        k_det = jnp.array([aug_index], dtype=jnp.int32)
        out_b = jax.block_until_ready(rotation_pallas(xb, k_det, mask_b))
        ref_b = jnp.rot90(xb, aug_index, axes=(2, 3))
        assert jnp.allclose(out_b, ref_b, atol=1e-5), (
            f"fallback path mismatch (k={aug_index})")

    print("KERNEL_OK")
</pallas_src>

<mosaic_0001>
module attributes {stable_mosaic.version = 11 : i64} {
  func.func @_flat_rot_kernel(%arg0: i32, %arg1: memref<8x1xf32, #tpu.memory_space<vmem>>, %arg2: memref<256x256xf32, #tpu.memory_space<vmem>>, %arg3: memref<8x256xf32, #tpu.memory_space<vmem>>, %arg4: memref<8x256xf32, #tpu.memory_space<vmem>>) attributes {dimension_semantics = [#tpu.dimension_semantics<parallel>], iteration_bounds = array<i64: 1>, scalar_prefetch = 0 : i64, scratch_operands = 0 : i64, tpu.core_type = #tpu.core_type<tc>, window_params = [{transform_indices = @transform_0, window_bounds = array<i64: 8, 1>}, {pipeline_mode = #tpu.pipeline_mode<synchronous>, transform_indices = @transform_1, window_bounds = array<i64: 256, 256>}, {transform_indices = @transform_2, window_bounds = array<i64: 8, 256>}, {transform_indices = @transform_3, window_bounds = array<i64: 8, 256>}]} {
    %c0 = arith.constant 0 : index
    %c0_0 = arith.constant 0 : index
    %0 = vector.load %arg3[%c0, %c0_0] : memref<8x256xf32, #tpu.memory_space<vmem>>, vector<8x256xf32>
    %c0_1 = arith.constant 0 : index
    %c0_2 = arith.constant 0 : index
    %1 = vector.load %arg2[%c0_1, %c0_2] : memref<256x256xf32, #tpu.memory_space<vmem>>, vector<256x256xf32>
    %cst = arith.constant dense<0.000000e+00> : vector<8x256xf32>
    %2 = tpu.matmul %0, %1, %cst {dimension_numbers = #tpu.dot_dimension_numbers<[1], [0], [0], [1], [0, 0, 1, 1], [], []>} : vector<8x256xf32>, vector<256x256xf32>, vector<8x256xf32> -> vector<8x256xf32>
    %c0_3 = arith.constant 0 : index
    %c0_4 = arith.constant 0 : index
    %3 = vector.load %arg1[%c0_3, %c0_4] : memref<8x1xf32, #tpu.memory_space<vmem>>, vector<8x1xf32>
    %4 = vector.broadcast %3 : vector<8x1xf32> to vector<8x256xf32>
    %5 = arith.mulf %4, %0 : vector<8x256xf32>
    %cst_5 = arith.constant 1.000000e+00 : f32
    %6 = vector.broadcast %cst_5 : f32 to vector<8x1xf32>
    %7 = arith.subf %6, %3 : vector<8x1xf32>
    %8 = vector.broadcast %7 : vector<8x1xf32> to vector<8x256xf32>
    %9 = arith.mulf %8, %2 : vector<8x256xf32>
    %10 = arith.addf %5, %9 : vector<8x256xf32>
    %c0_6 = arith.constant 0 : index
    %c0_7 = arith.constant 0 : index
    %11 = vector.load %arg4[%c0_6, %c0_7] : memref<8x256xf32, #tpu.memory_space<vmem>>, vector<8x256xf32>
    tpu.vector_store %arg4[%c0_6, %c0_7], %10 {strides = array<i32>} : memref<8x256xf32, #tpu.memory_space<vmem>>, vector<8x256xf32>,
    return
  }
  func.func @transform_0(%arg0: i32) -> (i32, i32) {
    %c0_i32 = arith.constant 0 : i32
    %c0_i32_0 = arith.constant 0 : i32
    return %arg0, %c0_i32 : i32, i32
  }
  func.func @transform_1(%arg0: i32) -> (i32, i32) {
    %c0_i32 = arith.constant 0 : i32
    %c0_i32_0 = arith.constant 0 : i32
    %c0_i32_1 = arith.constant 0 : i32
    return %c0_i32, %c0_i32_0 : i32, i32
  }
  func.func @transform_2(%arg0: i32) -> (i32, i32) {
    %c0_i32 = arith.constant 0 : i32
    %c0_i32_0 = arith.constant 0 : i32
    return %arg0, %c0_i32 : i32, i32
  }
  func.func @transform_3(%arg0: i32) -> (i32, i32) {
    %c0_i32 = arith.constant 0 : i32
    %c0_i32_0 = arith.constant 0 : i32
    return %arg0, %c0_i32 : i32, i32
  }
}

</mosaic_0001>

<bundles_post_ra>
// kernel: tpu_custom_call.1
= control target key start
LH: loop header
LB: loop body
LE: loop exit
PB: predicated region body
PF: predicated region fallthrough
CT: control target
= control target key end

     0   :  { %8 = vsyncpa [#allocation3], 0  ;;  %s381_s0 = inlined_call_operand.vmem [shape: f32[8,1], index: 0, kind: input, shape index: {}]   ;;  %s382_s1 = inlined_call_operand.hbm [shape: f32[256,256], index: 1, kind: input, shape index: {}]   ;;  %s383_s2 = inlined_call_operand.vmem [shape: f32[8,256], index: 2, kind: input, shape index: {}]   ;;  %s384_s3 = inlined_call_operand.hbm [shape: f32[8,256], index: 3, kind: output, shape index: {}]  }
   0x1   :  { %9 = vsyncpa [#allocation4], 0  ;;  %s319_s12 = smov [#allocation2]   ;;  %s271_s16 = scalar_lea.hbm %s382_s1, 8192 }
   0x2   :  { %s17_s13 = sshll.u32 %s319_s12, 4  ;;  %p272_p0 = scmp.ne.s32.totalorder %s382_s1, %s271_s16  ;;  %s18_s13 = int_to_ptr.vmem [resolvable:$true] %s17_s13 }
   0x3   :  { %p275_p1 = scmp.lt.u32.totalorder %s271_s16, %s382_s1 }
   0x5   :  { %p277_p2 = pnand %p275_p1, %p272_p0 }
   0x7   :  { %280 = shalt.err (!%p277_p2)
}
   0x8   :  { %s281_s21 = scalar_lea.vmem %s18_s13, 8192  ;;  %p286_p4 = scmp.lt.s32.totalorder %s18_s13, %s18_s13 }
   0x9   :  { %p282_p3 = scmp.ne.s32.totalorder %s18_s13, %s281_s21  ;;  %p287_p5 = scmp.lt.s32.totalorder %s281_s21, %s281_s21 }
   0xb   :  { %p288_p6 = por %p287_p5, %p286_p4 }
   0xd   :  { %p289_p7 = pnand %p288_p6, %p282_p3 }
   0xf   :  { %292 = shalt.err (!%p289_p7)
}
  0x10   :  { %s320_s22 = smov 256   ;;  %s321_s23 = smov 16  }
  0x11   :  { %23 = dma.hbm_to_vmem [thread:$0]  %s382_s1, 8192, %s18_s13, [#allocation3], %s320_s22, %s320_s22, %s321_s23  }
  0x12   :  { %315 = dma.done.wait [#allocation3], 8192  }
  0x13   :  { %316 = vsyncadd [#allocation3], 4294959104  ;;  %v322_v0 = vmov 0   ;;  %v32_v1 = vld [vmem:[#allocation2 + $0x8] sm:$0xff]  ;;  %v34_v2 = vld [vmem:[#allocation2 + $0x18] sm:$0xff]  ;;  %s323_s30 = smov [#allocation5]  }
  0x14   :  { %270 = vset.pattern.permute.xlu0 %v322_v0  ;;  %v31_v3 = vld [vmem:[#allocation2] sm:$0xff]  ;;  %v201_v4 = vpack.c.bf16 %v34_v2, %v32_v1  ;;  %v33_v5 = vld [vmem:[#allocation2 + $0x10] sm:$0xff]  ;;  %v36_v6 = vld [vmem:[#allocation2 + $0x28] sm:$0xff]  ;;  %s192_s4 = sshll.u32 %s323_s30, 4  ;;  %s193_s4 = int_to_ptr.vmem [resolvable:$true] %s192_s4 }
  0x15   :  { %v38_v7 = vld [vmem:[#allocation2 + $0x38] sm:$0xff]  ;;  %v203_v8 = vpack.c.bf16 %v33_v5, %v31_v3  ;;  %v35_v10 = vld [vmem:[#allocation2 + $0x20] sm:$0xff]  ;;  %v37_v11 = vld [vmem:[#allocation2 + $0x30] sm:$0xff]  ;;  %s293_s5 = scalar_lea.vmem %s193_s4, 256  ;;  %p298_p9 = scmp.lt.s32.totalorder %s193_s4, %s193_s4 }
  0x16   :  { %v205_v9 = vpack.c.bf16 %v38_v7, %v36_v6  ;;  %v40_v12 = vld [vmem:[#allocation2 + $0x48] sm:$0xff]  ;;  %202 = vmatprep.subr.bf16.mxu0 %v201_v4  ;;  %v42_v13 = vld [vmem:[#allocation2 + $0x58] sm:$0xff]  ;;  %v207_v14 = vpack.c.bf16 %v37_v11, %v35_v10  ;;  %v39_v16 = vld [vmem:[#allocation2 + $0x40] sm:$0xff]  ;;  %p294_p8 = scmp.ne.s32.totalorder %s193_s4, %s293_s5  ;;  %p299_p10 = scmp.lt.s32.totalorder %s293_s5, %s293_s5 }
  0x17   :  { %204 = vmatpush1.bf16.msra.mxu0 %v203_v8  ;;  %v209_v15 = vpack.c.bf16 %v42_v13, %v40_v12  ;;  %v41_v17 = vld [vmem:[#allocation2 + $0x50] sm:$0xff]  ;;  %v44_v18 = vld [vmem:[#allocation2 + $0x68] sm:$0xff]  ;;  %v46_v19 = vld [vmem:[#allocation2 + $0x78] sm:$0xff] }
  0x18   :  { %206 = vmatprep.subr.bf16.mxu0 %v205_v9  ;;  %v211_v20 = vpack.c.bf16 %v41_v17, %v39_v16  ;;  %v213_v21 = vpack.c.bf16 %v46_v19, %v44_v18  ;;  %v43_v22 = vld [vmem:[#allocation2 + $0x60] sm:$0xff]  ;;  %v45_v23 = vld [vmem:[#allocation2 + $0x70] sm:$0xff]  ;;  %v48_v24 = vld [vmem:[#allocation2 + $0x88] sm:$0xff]  ;;  %p300_p11 = por %p299_p10, %p298_p9 }
  0x19   :  { %v50_v25 = vld [vmem:[#allocation2 + $0x98] sm:$0xff]  ;;  %v215_v26 = vpack.c.bf16 %v45_v23, %v43_v22  ;;  %v47_v28 = vld [vmem:[#allocation2 + $0x80] sm:$0xff]  ;;  %v49_v29 = vld [vmem:[#allocation2 + $0x90] sm:$0xff] }
  0x1a   :  { %v217_v27 = vpack.c.bf16 %v50_v25, %v48_v24  ;;  %v52_v30 = vld [vmem:[#allocation2 + $0xa8] sm:$0xff]  ;;  %v54_v31 = vld [vmem:[#allocation2 + $0xb8] sm:$0xff]  ;;  %v219_v32 = vpack.c.bf16 %v49_v29, %v47_v28  ;;  %v51_v34 = vld [vmem:[#allocation2 + $0xa0] sm:$0xff]  ;;  %p301_p12 = pnand %p300_p11, %p294_p8 }
  0x1b   :  { %208 = vmatpush1.bf16.msra.mxu0 %v207_v14  ;;  %v221_v33 = vpack.c.bf16 %v54_v31, %v52_v30  ;;  %v53_v35 = vld [vmem:[#allocation2 + $0xb0] sm:$0xff]  ;;  %v56_v36 = vld [vmem:[#allocation2 + $0xc8] sm:$0xff]  ;;  %v58_v37 = vld [vmem:[#allocation2 + $0xd8] sm:$0xff] }
  0x1c   :  { %210 = vmatprep.subr.bf16.mxu0 %v209_v15  ;;  %v223_v38 = vpack.c.bf16 %v53_v35, %v51_v34  ;;  %v225_v39 = vpack.c.bf16 %v58_v37, %v56_v36  ;;  %v55_v40 = vld [vmem:[#allocation2 + $0xc0] sm:$0xff]  ;;  %v57_v41 = vld [vmem:[#allocation2 + $0xd0] sm:$0xff]  ;;  %v60_v43 = vld [vmem:[#allocation2 + $0xe8] sm:$0xff] }
  0x1d   :  { %v359_v42 = vld [vmem:[%s383_s2 + $0x8] sm:$0xff]  ;;  %v62_v44 = vld [vmem:[#allocation2 + $0xf8] sm:$0xff]  ;;  %v166_v45 = vld [vmem:[%s381_s0] sm:$0xff]  ;;  %v227_v47 = vpack.c.bf16 %v57_v41, %v55_v40 }
  0x1e   :  { %159 = vmatprep.mubr.f32.mxu0 %v359_v42  ;;  %169 = vperm.xlu0 %270, %v166_v45   ;;  %v174_v46 = vsub.f32 1.0, %v166_v45  ;;  %v229_v48 = vpack.c.bf16 %v62_v44, %v60_v43  ;;  %v59_v49 = vld [vmem:[#allocation2 + $0xe0] sm:$0xff]  ;;  %v61_v50 = vld [vmem:[#allocation2 + $0xf0] sm:$0xff]  ;;  %v64_v51 = vld [vmem:[#allocation2 + $0x108] sm:$0xff] }
  0x1f   :  { %212 = vmatpush1.bf16.msra.mxu0 %v211_v20  ;;  %v66_v52 = vld [vmem:[#allocation2 + $0x118] sm:$0xff]  ;;  %v231_v53 = vpack.c.bf16 %v61_v50, %v59_v49  ;;  %v63_v55 = vld [vmem:[#allocation2 + $0x100] sm:$0xff]  ;;  %v65_v56 = vld [vmem:[#allocation2 + $0x110] sm:$0xff] }
  0x20   :  { %214 = vmatprep.subr.bf16.mxu0 %v213_v21  ;;  %v233_v54 = vpack.c.bf16 %v66_v52, %v64_v51  ;;  %v68_v57 = vld [vmem:[#allocation2 + $0x128] sm:$0xff]  ;;  %v70_v58 = vld [vmem:[#allocation2 + $0x138] sm:$0xff]  ;;  %v235_v59 = vpack.c.bf16 %v65_v56, %v63_v55  ;;  %v67_v61 = vld [vmem:[#allocation2 + $0x120] sm:$0xff] }
  0x21   :  { %v237_v60 = vpack.c.bf16 %v70_v58, %v68_v57  ;;  %v69_v62 = vld [vmem:[#allocation2 + $0x130] sm:$0xff]  ;;  %v72_v63 = vld [vmem:[#allocation2 + $0x148] sm:$0xff]  ;;  %v74_v0 = vld [vmem:[#allocation2 + $0x158] sm:$0xff] }
  0x22   :  { %177 = vperm.xlu0 %270, %v174_v46   ;;  %v239_v1 = vpack.c.bf16 %v69_v62, %v67_v61  ;;  %v241_v2 = vpack.c.bf16 %v74_v0, %v72_v63  ;;  %v71_v3 = vld [vmem:[#allocation2 + $0x140] sm:$0xff]  ;;  %v73_v4 = vld [vmem:[#allocation2 + $0x150] sm:$0xff]  ;;  %v76_v5 = vld [vmem:[#allocation2 + $0x168] sm:$0xff] }
  0x23   :  { %216 = vmatpush1.bf16.msra.mxu0 %v215_v26  ;;  %v78_v6 = vld [vmem:[#allocation2 + $0x178] sm:$0xff]  ;;  %v243_v7 = vpack.c.bf16 %v73_v4, %v71_v3  ;;  %v75_v9 = vld [vmem:[#allocation2 + $0x160] sm:$0xff]  ;;  %v77_v10 = vld [vmem:[#allocation2 + $0x170] sm:$0xff] }
  0x24   :  { %218 = vmatprep.subr.bf16.mxu0 %v217_v27  ;;  %v245_v8 = vpack.c.bf16 %v78_v6, %v76_v5  ;;  %v80_v11 = vld [vmem:[#allocation2 + $0x188] sm:$0xff]  ;;  %v82_v12 = vld [vmem:[#allocation2 + $0x198] sm:$0xff]  ;;  %v247_v13 = vpack.c.bf16 %v77_v10, %v75_v9  ;;  %v79_v15 = vld [vmem:[#allocation2 + $0x180] sm:$0xff] }
  0x25   :  { %v249_v14 = vpack.c.bf16 %v82_v12, %v80_v11  ;;  %v81_v16 = vld [vmem:[#allocation2 + $0x190] sm:$0xff]  ;;  %v84_v17 = vld [vmem:[#allocation2 + $0x1a8] sm:$0xff]  ;;  %v86_v18 = vld [vmem:[#allocation2 + $0x1b8] sm:$0xff] }
  0x26   :  { %v251_v19 = vpack.c.bf16 %v81_v16, %v79_v15  ;;  %v253_v20 = vpack.c.bf16 %v86_v18, %v84_v17  ;;  %v83_v21 = vld [vmem:[#allocation2 + $0x1a0] sm:$0xff]  ;;  %v85_v22 = vld [vmem:[#allocation2 + $0x1b0] sm:$0xff]  ;;  %v88_v23 = vld [vmem:[#allocation2 + $0x1c8] sm:$0xff] }
  0x27   :  { %220 = vmatpush1.bf16.msra.mxu0 %v219_v32  ;;  %v90_v24 = vld [vmem:[#allocation2 + $0x1d8] sm:$0xff]  ;;  %v255_v25 = vpack.c.bf16 %v85_v22, %v83_v21  ;;  %v87_v27 = vld [vmem:[#allocation2 + $0x1c0] sm:$0xff]  ;;  %v89_v28 = vld [vmem:[#allocation2 + $0x1d0] sm:$0xff] }
  0x28   :  { %222 = vmatprep.subr.bf16.mxu0 %v221_v33  ;;  %v257_v26 = vpack.c.bf16 %v90_v24, %v88_v23  ;;  %v92_v29 = vld [vmem:[#allocation2 + $0x1e8] sm:$0xff]  ;;  %v94_v30 = vld [vmem:[#allocation2 + $0x1f8] sm:$0xff]  ;;  %v259_v31 = vpack.c.bf16 %v89_v28, %v87_v27  ;;  %v91_v33 = vld [vmem:[#allocation2 + $0x1e0] sm:$0xff] }
  0x29   :  { %v261_v32 = vpack.c.bf16 %v94_v30, %v92_v29  ;;  %v93_v34 = vld [vmem:[#allocation2 + $0x1f0] sm:$0xff]  ;;  %v29_v36 = vld [vmem:[%s383_s2] sm:$0xff] }
  0x2a   :  { %v263_v35 = vpack.c.bf16 %v93_v34, %v91_v33 }
  0x2b   :  { %224 = vmatpush1.bf16.msra.mxu0 %v223_v38 }
  0x2c   :  { %226 = vmatprep.subr.bf16.mxu0 %v225_v39 }
  0x2f   :  { %228 = vmatpush1.bf16.msra.mxu0 %v227_v47 }
  0x30   :  { %230 = vmatprep.subr.bf16.mxu0 %v229_v48 }
  0x33   :  { %232 = vmatpush1.bf16.msra.mxu0 %v231_v53 }
  0x34   :  { %234 = vmatprep.subr.bf16.mxu0 %v233_v54 }
  0x37   :  { %236 = vmatpush1.bf16.msra.mxu0 %v235_v59 }
  0x38   :  { %238 = vmatprep.subr.bf16.mxu0 %v237_v60 }
  0x3b   :  { %240 = vmatpush1.bf16.msra.mxu0 %v239_v1 }
  0x3c   :  { %242 = vmatprep.subr.bf16.mxu0 %v241_v2 }
  0x3f   :  { %244 = vmatpush1.bf16.msra.mxu0 %v243_v7 }
  0x40   :  { %246 = vmatprep.subr.bf16.mxu0 %v245_v8 }
  0x43   :  { %248 = vmatpush1.bf16.msra.mxu0 %v247_v13 }
  0x44   :  { %250 = vmatprep.subr.bf16.mxu0 %v249_v14 }
  0x47   :  { %252 = vmatpush1.bf16.msra.mxu0 %v251_v19 }
  0x48   :  { %254 = vmatprep.subr.bf16.mxu0 %v253_v20 }
  0x4b   :  { %256 = vmatpush1.bf16.msra.mxu0 %v255_v25 }
  0x4c   :  { %258 = vmatprep.subr.bf16.mxu0 %v257_v26 }
  0x4f   :  { %260 = vmatpush1.bf16.msra.mxu0 %v259_v31 }
  0x50   :  { %262 = vmatprep.subr.bf16.mxu0 %v261_v32 }
  0x53   :  { %264 = vmatpush1.bf16.msra.mxu0 %v263_v35 }
  0x56   :  { %160 = vmatmul.mubr.f32.vlgmr.msra.gmra.mrb[0].mxu0 %v29_v36 }
  0x9d   :  { %v170_v37 = vpop.permute.xlu0 %169 }
  0x9e   :  { %v172_v40 = vmul.f32 %v170_v37, %v29_v36  ;;  %v173_v44 = vmul.f32 %v170_v37, %v359_v42 }
  0xa1   :  { %v178_v38 = vpop.permute.xlu0 %177 }
 0x129   :  { %v161_v39 = vpop.f32.mrb[0].mxu0 }
 0x12a   :  { %v180_v41 = vmul.f32 %v178_v38, %v161_v39  ;;  %v163_v43 = vpop.f32.mrb[1].mxu0 }
 0x12b   :  { %v181_v45 = vmul.f32 %v178_v38, %v163_v43 }
 0x12c   :  { %v182_v46 = vadd.f32 %v180_v41, %v172_v40 }
 0x12d   :  { %v183_v47 = vadd.f32 %v181_v45, %v173_v44 }
 0x12e   :  { %184 = vst [vmem:[#allocation5] sm:$0xff] %v182_v46 }
 0x12f   :  { %185 = vst [vmem:[#allocation5 + $0x8] sm:$0xff] %v183_v47 }
 0x130   :  { %304 = shalt.err (!%p301_p12)
}
 0x131   :  { %s305_s7 = scalar_lea.hbm %s384_s3, 256 }
 0x132   :  { %p306_p13 = scmp.ne.s32.totalorder %s384_s3, %s305_s7  ;;  %p309_p0 = scmp.lt.u32.totalorder %s305_s7, %s384_s3 }
 0x134   :  { %p311_p1 = pnand %p309_p0, %p306_p13 }
 0x136   :  { %314 = shalt.err (!%p311_p1)
}
 0x137   :  { %195 = dma.vmem_to_hbm [thread:$0]  %s193_s4, 256, %s384_s3, [#allocation4]  }
 0x138   :  { %317 = dma.done.wait [#allocation4], 256  }
 0x139   :  { %318 = vsyncadd [#allocation4], 4294967040 }
 0x13a   :  { %199 = vsyncpa [#allocation3], 1 }
 0x13b   :  { %200 = vsyncpa [#allocation4], 1 }

</bundles_post_ra>
